<compile_context>
chip_gen: v6e
topology: v6e:2x2x1
jax: 0.10.0
libtpu: 0.0.40
codegen_flags: <defaults>
</compile_context>

<pallas_src>
import functools

import jax
import jax.numpy as jnp
from jax import lax
from jax.experimental import pallas as pl
from jax.experimental.pallas import tpu as pltpu


# ---------------------------------------------------------------------------
# Fused Pallas kernel (one grid step == one batch element).
# ---------------------------------------------------------------------------
def _fused_generator_kernel(cols1_ref, w1_ref, b1_ref, wp_ref, b2_ref,
                            out_ref, y1pad_ref, *, h1, w1, c1, n_out):
    # ---- Layer 1: (H1*W1, K1) @ (K1, C1) + b1, ReLU. bf16 MXU, f32 acc. ----
    y1 = jnp.dot(cols1_ref[0], w1_ref[...], preferred_element_type=jnp.float32)
    y1 = jnp.maximum(y1 + b1_ref[...], 0.0)

    # Stage y1 into a spatially zero-padded VMEM scratch (never touches HBM).
    # Zero the whole scratch every step so per-core scratch copies stay correct
    # when the "parallel" batch axis is sharded across v7x's two TensorCores.
    y1pad_ref[...] = jnp.zeros_like(y1pad_ref)
    y1pad_ref[1:h1 + 1, 1:w1 + 1, :] = y1.reshape(h1, w1, c1)

    # ---- Layer 2: ConvTranspose(k=4, s=2, p=1) as a 3x3/s1/p1 conv into the
    # 4 polyphase outputs: 9 shifted accumulating dots, each K = C1 = 64. ----
    acc = jnp.zeros((h1 * w1, n_out), jnp.float32)
    for dh in range(3):
        for dw in range(3):
            slab = y1pad_ref[dh:dh + h1, dw:dw + w1, :]
            slab = slab.reshape(h1 * w1, c1).astype(jnp.bfloat16)
            acc = acc + jnp.dot(slab, wp_ref[3 * dh + dw],
                                preferred_element_type=jnp.float32)

    # Bias + tanh only on the n_out (=12) real columns; no padded lanes.
    out_ref[0] = jnp.tanh(acc + b2_ref[...]).astype(out_ref.dtype)


# ---------------------------------------------------------------------------
# JAX-side glue (layer-1 im2col / weight repacking) — fused by XLA around the
# single pallas_call.
# ---------------------------------------------------------------------------
def _im2col_nhwc(x, k, stride, padding):
    """x: (N, H, W, C) -> (N, Ho, Wo, k*k*C); column order (kh, kw, c)."""
    n, h, w, c = x.shape
    xp = jnp.pad(x, ((0, 0), (padding, padding), (padding, padding), (0, 0)))
    ho = (h + 2 * padding - k) // stride + 1
    wo = (w + 2 * padding - k) // stride + 1
    cols = []
    for kh in range(k):
        for kw in range(k):
            cols.append(xp[:, kh:kh + stride * ho:stride,
                           kw:kw + stride * wo:stride, :])
    return jnp.concatenate(cols, axis=-1)


def _convt_polyphase_weight(w2):
    """ConvTranspose2d(k=4, s=2, p=1) weight (Cin, Cout, 4, 4) -> (9, Cin, 4*Cout).

    Tap index t = 3*dh + dw matches a 3x3 / stride-1 / pad-1 neighborhood of
    the (un-dilated) layer-1 output; columns are (phase = 2*da + db, cout),
    where the output pixel is (2*a + da, 2*b + db) for input pixel (a, b).
    """
    cin, cout, kh, kw = w2.shape
    assert (kh, kw) == (4, 4)
    # oh = 2*ih - 1 + kh, with ih = a - 1 + dh and oh = 2*a + da  =>  kh = da - 2*dh + 3
    kmap = {0: {0: 3, 1: 1}, 1: {1: 2, 2: 0}}        # da -> {dh: kh}
    wp = jnp.zeros((9, cin, 4, cout), w2.dtype)
    for da in (0, 1):
        for db in (0, 1):
            phase = 2 * da + db
            for dh, kh_i in kmap[da].items():
                for dw, kw_i in kmap[db].items():
                    wp = wp.at[3 * dh + dw, :, phase, :].set(w2[:, :, kh_i, kw_i])
    return wp.reshape(9, cin, 4 * cout)


def generator_forward(x, params):
    w1, b1, w2, b2 = params["w1"], params["b1"], params["w2"], params["b2"]
    n, cin, h, w = x.shape
    cout1 = w1.shape[0]                               # 64
    cout2 = w2.shape[1]                               # 3
    h1, w1sp = h // 2, w // 2                         # layer-1 spatial dims
    k1 = 4 * 4 * cin                                  # 48
    n_out = 4 * cout2                                 # 12 = (2x2 phase, cout2)

    # ---- layer-1 im2col in XLA, built directly in bf16 (single pass) ----
    x_nhwc = jnp.transpose(x, (0, 2, 3, 1)).astype(jnp.bfloat16)
    cols1 = _im2col_nhwc(x_nhwc, k=4, stride=2, padding=1)       # (N,H1,W1,48)
    cols1 = cols1.reshape(n, h1 * w1sp, k1)

    # ---- weights / biases repacked once ----
    w1_mat = jnp.transpose(w1, (2, 3, 1, 0)).reshape(k1, cout1).astype(jnp.bfloat16)
    b1_row = b1.reshape(1, cout1).astype(jnp.float32)
    wp = _convt_polyphase_weight(w2).astype(jnp.bfloat16)        # (9, 64, 12)
    b2_row = jnp.tile(b2, 4).reshape(1, n_out).astype(jnp.float32)

    kernel = functools.partial(_fused_generator_kernel,
                               h1=h1, w1=w1sp, c1=cout1, n_out=n_out)
    y2 = pl.pallas_call(
        kernel,
        out_shape=jax.ShapeDtypeStruct((n, h1 * w1sp, n_out), jnp.float32),
        grid=(n,),
        in_specs=[
            pl.BlockSpec((1, h1 * w1sp, k1), lambda b: (b, 0, 0)),   # cols1 (per batch)
            pl.BlockSpec((k1, cout1), lambda b: (0, 0)),             # w1 (resident)
            pl.BlockSpec((1, cout1), lambda b: (0, 0)),              # b1 (resident)
            pl.BlockSpec((9, cout1, n_out), lambda b: (0, 0, 0)),    # wp (resident)
            pl.BlockSpec((1, n_out), lambda b: (0, 0)),              # b2 (resident)
        ],
        out_specs=pl.BlockSpec((1, h1 * w1sp, n_out), lambda b: (b, 0, 0)),
        scratch_shapes=[pltpu.VMEM((h1 + 2, w1sp + 2, cout1), jnp.float32)],
        compiler_params=pltpu.CompilerParams(
            dimension_semantics=("parallel",),
            vmem_limit_bytes=32 * 1024 * 1024,
        ),
    )(cols1, w1_mat, b1_row, wp, b2_row)

    # (n, a, b, da, db, c) -> (n, c, 2a+da, 2b+db): single transpose to NCHW.
    y2 = y2.reshape(n, h1, w1sp, 2, 2, cout2)
    y2 = jnp.transpose(y2, (0, 5, 1, 3, 2, 4))
    return y2.reshape(n, cout2, 2 * h1, 2 * w1sp)


# ---------------------------------------------------------------------------
# Pure-JAX reference (f32 lax convolutions) for correctness checking.
# ---------------------------------------------------------------------------
def reference_forward(x, params):
    w1, b1, w2, b2 = params["w1"], params["b1"], params["w2"], params["b2"]
    dn = ("NCHW", "OIHW", "NCHW")
    y1 = lax.conv_general_dilated(x, w1, window_strides=(2, 2),
                                  padding=((1, 1), (1, 1)),
                                  dimension_numbers=dn,
                                  precision=lax.Precision.HIGHEST)
    y1 = jnp.maximum(y1 + b1[None, :, None, None], 0.0)
    w2_conv = jnp.flip(w2, axis=(2, 3)).transpose(1, 0, 2, 3)
    y2 = lax.conv_general_dilated(y1, w2_conv, window_strides=(1, 1),
                                  padding=((2, 2), (2, 2)),
                                  lhs_dilation=(2, 2),
                                  dimension_numbers=dn,
                                  precision=lax.Precision.HIGHEST)
    return jnp.tanh(y2 + b2[None, :, None, None])


def init_params(key):
    # Deterministic synthetic weights; shapes follow nn.Conv2d / nn.ConvTranspose2d.
    k1, k2, k3, k4 = jax.random.split(key, 4)
    return {
        "w1": jax.random.normal(k1, (64, 3, 4, 4), jnp.float32) * 0.05,  # Conv2d (out,in,kh,kw)
        "b1": jax.random.normal(k2, (64,), jnp.float32) * 0.05,
        "w2": jax.random.normal(k3, (64, 3, 4, 4), jnp.float32) * 0.05,  # ConvT (in,out,kh,kw)
        "b2": jax.random.normal(k4, (3,), jnp.float32) * 0.05,
    }


if __name__ == "__main__":
    key = jax.random.PRNGKey(0)
    kx, kp = jax.random.split(key)
    x = jax.random.normal(kx, (2, 3, 16, 16), jnp.float32)
    params = init_params(kp)

    out = jax.jit(generator_forward)(x, params)
    out = jax.block_until_ready(out)
    assert out.shape == (2, 3, 16, 16), out.shape

    ref = reference_forward(x, params)
    err = float(jnp.max(jnp.abs(out - ref)))
    # bf16 MXU inputs (f32 accumulation) vs. f32 reference -> loose tolerance.
    assert err < 2e-2, err

    print("KERNEL_OK")
</pallas_src>

<mosaic_0001>
module attributes {stable_mosaic.version = 11 : i64} {
  func.func @_fused_generator_kernel(%arg0: i32, %arg1: memref<1x64x48xbf16, #tpu.memory_space<vmem>>, %arg2: memref<48x64xbf16, #tpu.memory_space<vmem>>, %arg3: memref<1x64xf32, #tpu.memory_space<vmem>>, %arg4: memref<9x64x12xbf16, #tpu.memory_space<vmem>>, %arg5: memref<1x12xf32, #tpu.memory_space<vmem>>, %arg6: memref<1x64x12xf32, #tpu.memory_space<vmem>>, %arg7: memref<10x10x64xf32, #tpu.memory_space<vmem>>) attributes {dimension_semantics = [#tpu.dimension_semantics<parallel>], iteration_bounds = array<i64: 2>, scalar_prefetch = 0 : i64, scratch_operands = 1 : i64, tpu.core_type = #tpu.core_type<tc>, window_params = [{transform_indices = @transform_0, window_bounds = array<i64: 1, 64, 48>}, {pipeline_mode = #tpu.pipeline_mode<synchronous>, transform_indices = @transform_1, window_bounds = array<i64: 48, 64>}, {pipeline_mode = #tpu.pipeline_mode<synchronous>, transform_indices = @transform_2, window_bounds = array<i64: 1, 64>}, {pipeline_mode = #tpu.pipeline_mode<synchronous>, transform_indices = @transform_3, window_bounds = array<i64: 9, 64, 12>}, {pipeline_mode = #tpu.pipeline_mode<synchronous>, transform_indices = @transform_4, window_bounds = array<i64: 1, 12>}, {transform_indices = @transform_5, window_bounds = array<i64: 1, 64, 12>}]} {
    %c0 = arith.constant 0 : index
    %c0_0 = arith.constant 0 : index
    %c0_1 = arith.constant 0 : index
    %0 = vector.load %arg1[%c0, %c0_0, %c0_1] : memref<1x64x48xbf16, #tpu.memory_space<vmem>>, vector<1x64x48xbf16>
    %1 = vector.shape_cast %0 : vector<1x64x48xbf16> to vector<64x48xbf16>
    %c0_2 = arith.constant 0 : index
    %c0_3 = arith.constant 0 : index
    %2 = vector.load %arg2[%c0_2, %c0_3] : memref<48x64xbf16, #tpu.memory_space<vmem>>, vector<48x64xbf16>
    %cst = arith.constant dense<0.000000e+00> : vector<64x64xf32>
    %3 = tpu.matmul %1, %2, %cst {dimension_numbers = #tpu.dot_dimension_numbers<[1], [0], [0], [1], [0, 0, 1, 1], [], []>} : vector<64x48xbf16>, vector<48x64xbf16>, vector<64x64xf32> -> vector<64x64xf32>
    %c0_4 = arith.constant 0 : index
    %c0_5 = arith.constant 0 : index
    %4 = vector.load %arg3[%c0_4, %c0_5] : memref<1x64xf32, #tpu.memory_space<vmem>>, vector<1x64xf32>
    %5 = vector.broadcast %4 : vector<1x64xf32> to vector<64x64xf32>
    %6 = arith.addf %3, %5 : vector<64x64xf32>
    %cst_6 = arith.constant 0.000000e+00 : f32
    %7 = vector.broadcast %cst_6 : f32 to vector<64x64xf32>
    %8 = arith.maximumf %6, %7 : vector<64x64xf32>
    %cst_7 = arith.constant 0.000000e+00 : f32
    %9 = vector.broadcast %cst_7 : f32 to vector<10x10x64xf32>
    %c0_8 = arith.constant 0 : index
    %c0_9 = arith.constant 0 : index
    %c0_10 = arith.constant 0 : index
    %10 = vector.load %arg7[%c0_8, %c0_9, %c0_10] : memref<10x10x64xf32, #tpu.memory_space<vmem>>, vector<10x10x64xf32>
    tpu.vector_store %arg7[%c0_8, %c0_9, %c0_10], %9 {strides = array<i32>} : memref<10x10x64xf32, #tpu.memory_space<vmem>>, vector<10x10x64xf32>,
    %11 = vector.shape_cast %8 : vector<64x64xf32> to vector<8x8x64xf32>
    %c1 = arith.constant 1 : index
    %c1_11 = arith.constant 1 : index
    %c0_12 = arith.constant 0 : index
    %12 = vector.load %arg7[%c1, %c1_11, %c0_12] : memref<10x10x64xf32, #tpu.memory_space<vmem>>, vector<8x8x64xf32>
    tpu.vector_store %arg7[%c1, %c1_11, %c0_12], %11 {strides = array<i32>} : memref<10x10x64xf32, #tpu.memory_space<vmem>>, vector<8x8x64xf32>,
    %cst_13 = arith.constant 0.000000e+00 : f32
    %13 = vector.broadcast %cst_13 : f32 to vector<64x12xf32>
    %c0_14 = arith.constant 0 : index
    %c0_15 = arith.constant 0 : index
    %c0_16 = arith.constant 0 : index
    %14 = vector.load %arg7[%c0_14, %c0_15, %c0_16] : memref<10x10x64xf32, #tpu.memory_space<vmem>>, vector<8x8x64xf32>
    %15 = vector.shape_cast %14 : vector<8x8x64xf32> to vector<64x64xf32>
    %16 = arith.truncf %15 : vector<64x64xf32> to vector<64x64xbf16>
    %c0_17 = arith.constant 0 : index
    %c0_18 = arith.constant 0 : index
    %c0_19 = arith.constant 0 : index
    %17 = vector.load %arg4[%c0_17, %c0_18, %c0_19] : memref<9x64x12xbf16, #tpu.memory_space<vmem>>, vector<1x64x12xbf16>
    %18 = vector.shape_cast %17 : vector<1x64x12xbf16> to vector<64x12xbf16>
    %cst_20 = arith.constant dense<0.000000e+00> : vector<64x12xf32>
    %19 = tpu.matmul %16, %18, %cst_20 {dimension_numbers = #tpu.dot_dimension_numbers<[1], [0], [0], [1], [0, 0, 1, 1], [], []>} : vector<64x64xbf16>, vector<64x12xbf16>, vector<64x12xf32> -> vector<64x12xf32>
    %20 = arith.addf %13, %19 : vector<64x12xf32>
    %c0_21 = arith.constant 0 : index
    %c1_22 = arith.constant 1 : index
    %c0_23 = arith.constant 0 : index
    %21 = vector.load %arg7[%c0_21, %c1_22, %c0_23] : memref<10x10x64xf32, #tpu.memory_space<vmem>>, vector<8x8x64xf32>
    %22 = vector.shape_cast %21 : vector<8x8x64xf32> to vector<64x64xf32>
    %23 = arith.truncf %22 : vector<64x64xf32> to vector<64x64xbf16>
    %c1_24 = arith.constant 1 : index
    %c0_25 = arith.constant 0 : index
    %c0_26 = arith.constant 0 : index
    %24 = vector.load %arg4[%c1_24, %c0_25, %c0_26] : memref<9x64x12xbf16, #tpu.memory_space<vmem>>, vector<1x64x12xbf16>
    %25 = vector.shape_cast %24 : vector<1x64x12xbf16> to vector<64x12xbf16>
    %cst_27 = arith.constant dense<0.000000e+00> : vector<64x12xf32>
    %26 = tpu.matmul %23, %25, %cst_27 {dimension_numbers = #tpu.dot_dimension_numbers<[1], [0], [0], [1], [0, 0, 1, 1], [], []>} : vector<64x64xbf16>, vector<64x12xbf16>, vector<64x12xf32> -> vector<64x12xf32>
    %27 = arith.addf %20, %26 : vector<64x12xf32>
    %c0_28 = arith.constant 0 : index
    %c2 = arith.constant 2 : index
    %c0_29 = arith.constant 0 : index
    %28 = vector.load %arg7[%c0_28, %c2, %c0_29] : memref<10x10x64xf32, #tpu.memory_space<vmem>>, vector<8x8x64xf32>
    %29 = vector.shape_cast %28 : vector<8x8x64xf32> to vector<64x64xf32>
    %30 = arith.truncf %29 : vector<64x64xf32> to vector<64x64xbf16>
    %c2_30 = arith.constant 2 : index
    %c0_31 = arith.constant 0 : index
    %c0_32 = arith.constant 0 : index
    %31 = vector.load %arg4[%c2_30, %c0_31, %c0_32] : memref<9x64x12xbf16, #tpu.memory_space<vmem>>, vector<1x64x12xbf16>
    %32 = vector.shape_cast %31 : vector<1x64x12xbf16> to vector<64x12xbf16>
    %cst_33 = arith.constant dense<0.000000e+00> : vector<64x12xf32>
    %33 = tpu.matmul %30, %32, %cst_33 {dimension_numbers = #tpu.dot_dimension_numbers<[1], [0], [0], [1], [0, 0, 1, 1], [], []>} : vector<64x64xbf16>, vector<64x12xbf16>, vector<64x12xf32> -> vector<64x12xf32>
    %34 = arith.addf %27, %33 : vector<64x12xf32>
    %c1_34 = arith.constant 1 : index
    %c0_35 = arith.constant 0 : index
    %c0_36 = arith.constant 0 : index
    %35 = vector.load %arg7[%c1_34, %c0_35, %c0_36] : memref<10x10x64xf32, #tpu.memory_space<vmem>>, vector<8x8x64xf32>
    %36 = vector.shape_cast %35 : vector<8x8x64xf32> to vector<64x64xf32>
    %37 = arith.truncf %36 : vector<64x64xf32> to vector<64x64xbf16>
    %c3 = arith.constant 3 : index
    %c0_37 = arith.constant 0 : index
    %c0_38 = arith.constant 0 : index
    %38 = vector.load %arg4[%c3, %c0_37, %c0_38] : memref<9x64x12xbf16, #tpu.memory_space<vmem>>, vector<1x64x12xbf16>
    %39 = vector.shape_cast %38 : vector<1x64x12xbf16> to vector<64x12xbf16>
    %cst_39 = arith.constant dense<0.000000e+00> : vector<64x12xf32>
    %40 = tpu.matmul %37, %39, %cst_39 {dimension_numbers = #tpu.dot_dimension_numbers<[1], [0], [0], [1], [0, 0, 1, 1], [], []>} : vector<64x64xbf16>, vector<64x12xbf16>, vector<64x12xf32> -> vector<64x12xf32>
    %41 = arith.addf %34, %40 : vector<64x12xf32>
    %c1_40 = arith.constant 1 : index
    %c1_41 = arith.constant 1 : index
    %c0_42 = arith.constant 0 : index
    %42 = vector.load %arg7[%c1_40, %c1_41, %c0_42] : memref<10x10x64xf32, #tpu.memory_space<vmem>>, vector<8x8x64xf32>
    %43 = vector.shape_cast %42 : vector<8x8x64xf32> to vector<64x64xf32>
    %44 = arith.truncf %43 : vector<64x64xf32> to vector<64x64xbf16>
    %c4 = arith.constant 4 : index
    %c0_43 = arith.constant 0 : index
    %c0_44 = arith.constant 0 : index
    %45 = vector.load %arg4[%c4, %c0_43, %c0_44] : memref<9x64x12xbf16, #tpu.memory_space<vmem>>, vector<1x64x12xbf16>
    %46 = vector.shape_cast %45 : vector<1x64x12xbf16> to vector<64x12xbf16>
    %cst_45 = arith.constant dense<0.000000e+00> : vector<64x12xf32>
    %47 = tpu.matmul %44, %46, %cst_45 {dimension_numbers = #tpu.dot_dimension_numbers<[1], [0], [0], [1], [0, 0, 1, 1], [], []>} : vector<64x64xbf16>, vector<64x12xbf16>, vector<64x12xf32> -> vector<64x12xf32>
    %48 = arith.addf %41, %47 : vector<64x12xf32>
    %c1_46 = arith.constant 1 : index
    %c2_47 = arith.constant 2 : index
    %c0_48 = arith.constant 0 : index
    %49 = vector.load %arg7[%c1_46, %c2_47, %c0_48] : memref<10x10x64xf32, #tpu.memory_space<vmem>>, vector<8x8x64xf32>
    %50 = vector.shape_cast %49 : vector<8x8x64xf32> to vector<64x64xf32>
    %51 = arith.truncf %50 : vector<64x64xf32> to vector<64x64xbf16>
    %c5 = arith.constant 5 : index
    %c0_49 = arith.constant 0 : index
    %c0_50 = arith.constant 0 : index
    %52 = vector.load %arg4[%c5, %c0_49, %c0_50] : memref<9x64x12xbf16, #tpu.memory_space<vmem>>, vector<1x64x12xbf16>
    %53 = vector.shape_cast %52 : vector<1x64x12xbf16> to vector<64x12xbf16>
    %cst_51 = arith.constant dense<0.000000e+00> : vector<64x12xf32>
    %54 = tpu.matmul %51, %53, %cst_51 {dimension_numbers = #tpu.dot_dimension_numbers<[1], [0], [0], [1], [0, 0, 1, 1], [], []>} : vector<64x64xbf16>, vector<64x12xbf16>, vector<64x12xf32> -> vector<64x12xf32>
    %55 = arith.addf %48, %54 : vector<64x12xf32>
    %c2_52 = arith.constant 2 : index
    %c0_53 = arith.constant 0 : index
    %c0_54 = arith.constant 0 : index
    %56 = vector.load %arg7[%c2_52, %c0_53, %c0_54] : memref<10x10x64xf32, #tpu.memory_space<vmem>>, vector<8x8x64xf32>
    %57 = vector.shape_cast %56 : vector<8x8x64xf32> to vector<64x64xf32>
    %58 = arith.truncf %57 : vector<64x64xf32> to vector<64x64xbf16>
    %c6 = arith.constant 6 : index
    %c0_55 = arith.constant 0 : index
    %c0_56 = arith.constant 0 : index
    %59 = vector.load %arg4[%c6, %c0_55, %c0_56] : memref<9x64x12xbf16, #tpu.memory_space<vmem>>, vector<1x64x12xbf16>
    %60 = vector.shape_cast %59 : vector<1x64x12xbf16> to vector<64x12xbf16>
    %cst_57 = arith.constant dense<0.000000e+00> : vector<64x12xf32>
    %61 = tpu.matmul %58, %60, %cst_57 {dimension_numbers = #tpu.dot_dimension_numbers<[1], [0], [0], [1], [0, 0, 1, 1], [], []>} : vector<64x64xbf16>, vector<64x12xbf16>, vector<64x12xf32> -> vector<64x12xf32>
    %62 = arith.addf %55, %61 : vector<64x12xf32>
    %c2_58 = arith.constant 2 : index
    %c1_59 = arith.constant 1 : index
    %c0_60 = arith.constant 0 : index
    %63 = vector.load %arg7[%c2_58, %c1_59, %c0_60] : memref<10x10x64xf32, #tpu.memory_space<vmem>>, vector<8x8x64xf32>
    %64 = vector.shape_cast %63 : vector<8x8x64xf32> to vector<64x64xf32>
    %65 = arith.truncf %64 : vector<64x64xf32> to vector<64x64xbf16>
    %c7 = arith.constant 7 : index
    %c0_61 = arith.constant 0 : index
    %c0_62 = arith.constant 0 : index
    %66 = vector.load %arg4[%c7, %c0_61, %c0_62] : memref<9x64x12xbf16, #tpu.memory_space<vmem>>, vector<1x64x12xbf16>
    %67 = vector.shape_cast %66 : vector<1x64x12xbf16> to vector<64x12xbf16>
    %cst_63 = arith.constant dense<0.000000e+00> : vector<64x12xf32>
    %68 = tpu.matmul %65, %67, %cst_63 {dimension_numbers = #tpu.dot_dimension_numbers<[1], [0], [0], [1], [0, 0, 1, 1], [], []>} : vector<64x64xbf16>, vector<64x12xbf16>, vector<64x12xf32> -> vector<64x12xf32>
    %69 = arith.addf %62, %68 : vector<64x12xf32>
    %c2_64 = arith.constant 2 : index
    %c2_65 = arith.constant 2 : index
    %c0_66 = arith.constant 0 : index
    %70 = vector.load %arg7[%c2_64, %c2_65, %c0_66] : memref<10x10x64xf32, #tpu.memory_space<vmem>>, vector<8x8x64xf32>
    %71 = vector.shape_cast %70 : vector<8x8x64xf32> to vector<64x64xf32>
    %72 = arith.truncf %71 : vector<64x64xf32> to vector<64x64xbf16>
    %c8 = arith.constant 8 : index
    %c0_67 = arith.constant 0 : index
    %c0_68 = arith.constant 0 : index
    %73 = vector.load %arg4[%c8, %c0_67, %c0_68] : memref<9x64x12xbf16, #tpu.memory_space<vmem>>, vector<1x64x12xbf16>
    %74 = vector.shape_cast %73 : vector<1x64x12xbf16> to vector<64x12xbf16>
    %cst_69 = arith.constant dense<0.000000e+00> : vector<64x12xf32>
    %75 = tpu.matmul %72, %74, %cst_69 {dimension_numbers = #tpu.dot_dimension_numbers<[1], [0], [0], [1], [0, 0, 1, 1], [], []>} : vector<64x64xbf16>, vector<64x12xbf16>, vector<64x12xf32> -> vector<64x12xf32>
    %76 = arith.addf %69, %75 : vector<64x12xf32>
    %c0_70 = arith.constant 0 : index
    %c0_71 = arith.constant 0 : index
    %77 = vector.load %arg5[%c0_70, %c0_71] : memref<1x12xf32, #tpu.memory_space<vmem>>, vector<1x12xf32>
    %78 = vector.broadcast %77 : vector<1x12xf32> to vector<64x12xf32>
    %79 = arith.addf %76, %78 : vector<64x12xf32>
    %80 = math.tanh %79 : vector<64x12xf32>
    %c0_72 = arith.constant 0 : index
    %c0_73 = arith.constant 0 : index
    %c0_74 = arith.constant 0 : index
    %81 = vector.load %arg6[%c0_72, %c0_73, %c0_74] : memref<1x64x12xf32, #tpu.memory_space<vmem>>, vector<1x64x12xf32>
    %82 = vector.shape_cast %81 : vector<1x64x12xf32> to vector<64x12xf32>
    %83 = vector.shape_cast %80 : vector<64x12xf32> to vector<1x64x12xf32>
    tpu.vector_store %arg6[%c0_72, %c0_73, %c0_74], %83 {strides = array<i32>} : memref<1x64x12xf32, #tpu.memory_space<vmem>>, vector<1x64x12xf32>,
    return
  }
  func.func @transform_0(%arg0: i32) -> (i32, i32, i32) {
    %c0_i32 = arith.constant 0 : i32
    %c0_i32_0 = arith.constant 0 : i32
    %c0_i32_1 = arith.constant 0 : i32
    return %arg0, %c0_i32, %c0_i32_0 : i32, i32, i32
  }
  func.func @transform_1(%arg0: i32) -> (i32, i32) {
    %c0_i32 = arith.constant 0 : i32
    %c0_i32_0 = arith.constant 0 : i32
    %c0_i32_1 = arith.constant 0 : i32
    return %c0_i32, %c0_i32_0 : i32, i32
  }
  func.func @transform_2(%arg0: i32) -> (i32, i32) {
    %c0_i32 = arith.constant 0 : i32
    %c0_i32_0 = arith.constant 0 : i32
    %c0_i32_1 = arith.constant 0 : i32
    return %c0_i32, %c0_i32_0 : i32, i32
  }
  func.func @transform_3(%arg0: i32) -> (i32, i32, i32) {
    %c0_i32 = arith.constant 0 : i32
    %c0_i32_0 = arith.constant 0 : i32
    %c0_i32_1 = arith.constant 0 : i32
    %c0_i32_2 = arith.constant 0 : i32
    return %c0_i32, %c0_i32_0, %c0_i32_1 : i32, i32, i32
  }
  func.func @transform_4(%arg0: i32) -> (i32, i32) {
    %c0_i32 = arith.constant 0 : i32
    %c0_i32_0 = arith.constant 0 : i32
    %c0_i32_1 = arith.constant 0 : i32
    return %c0_i32, %c0_i32_0 : i32, i32
  }
  func.func @transform_5(%arg0: i32) -> (i32, i32, i32) {
    %c0_i32 = arith.constant 0 : i32
    %c0_i32_0 = arith.constant 0 : i32
    %c0_i32_1 = arith.constant 0 : i32
    return %arg0, %c0_i32, %c0_i32_0 : i32, i32, i32
  }
}

</mosaic_0001>

<bundles_post_ra>
// kernel: tile.8
= control target key start
LH: loop header
LB: loop body
LE: loop exit
PB: predicated region body
PF: predicated region fallthrough
CT: control target
= control target key end

     0   :  { %s22_s0 = inlined_call_operand.vmem [shape: f32[3], index: 0, kind: input, shape index: {}]   ;;  %s23_s1 = inlined_call_operand.vmem [shape: f32[4,3], index: 1, kind: output, shape index: {}]  }
   0x1   :  { %v4_v0 = vld [vmem:[%s22_s0] ss:$0 sm:$0xff] }
   0x2   :  { %5 = vst [vmem:[%s23_s1] sm:$0xf] %v4_v0 }

// kernel: tile.9
= control target key start
LH: loop header
LB: loop body
LE: loop exit
PB: predicated region body
PF: predicated region fallthrough
CT: control target
= control target key end

     0   :  { %vm8_vm0 = vcmask 23552   ;;  %s40_s8 = smov 3   ;;  %s41_s9 = smov 6   ;;  %vm14_vm1 = vcmask 97352   ;;  %vm20_vm2 = vcmask 72752   ;;  %vm26_vm3 = vcmask 48152   ;;  %s58_s0 = inlined_call_operand.vmem [shape: f32[4,3], index: 0, kind: input, shape index: {}]   ;;  %s59_s1 = inlined_call_operand.vmem [shape: f32[1,12], index: 1, kind: output, shape index: {}]  }
   0x1   :  { %v5_v0 = vld [vmem:[%s58_s0] sm:$0xf]  ;;  %s39_s0 = smov 9  }
   0x2   :  { %6 = vst [vmem:[#allocation1] sm:$0xf] %v5_v0 }
   0x9   :  { %v11_v1 = vld [vmem:[#allocation1 + $0x3] sm:$0x1]   ;;  %v23_v2 = vld [vmem:[#allocation1 + $0x1] sm:$0x1]   ;;  %v7_v3 = vld [vmem:[#allocation1] sm:$0x1]  }
   0xa   :  { %12 = vrot.lane.b32.xlu0 %v11_v1, %s39_s0  ;;  %24 = vrot.lane.b32.xlu1 %v23_v2, %s40_s8  ;;  %v17_v4 = vld [vmem:[#allocation1 + $0x2] sm:$0x1]   ;;  %9 = vst.msk [vmem:[#allocation0] sm:$0x1] %vm8_vm0, %v7_v3  }
   0xe   :  { %18 = vrot.lane.b32.xlu0 %v17_v4, %s41_s9 }
  0x7c   :  { %v13_v5 = vpop.permute.xlu0 %12   ;;  %v25_v6 = vpop.permute.xlu1 %24  }
  0x7d   :  { %15 = vst.msk [vmem:[#allocation0] sm:$0x1] %vm14_vm1, %v13_v5  }
  0x80   :  { %v19_v7 = vpop.permute.xlu0 %18  }
  0x81   :  { %21 = vst.msk [vmem:[#allocation0] sm:$0x1] %vm20_vm2, %v19_v7  }
  0x82   :  { %27 = vst.msk [vmem:[#allocation0] sm:$0x1] %vm26_vm3, %v25_v6  }
  0x89   :  { %v32_v8 = vld [vmem:[#allocation0] sm:$0x1] }
  0x8a   :  { %35 = vst [vmem:[%s59_s1] sm:$0x1] %v32_v8 }

// kernel: generator_forward.1
= control target key start
LH: loop header
LB: loop body
LE: loop exit
PB: predicated region body
PF: predicated region fallthrough
CT: control target
= control target key end

     0   :  { %s2149_s18 = smov 0   ;;  %s2460_s0 = inlined_call_operand.vmem [shape: bf16[2,64,48], index: 0, kind: input, shape index: {}]   ;;  %s2461_s1 = inlined_call_operand.vmem [shape: bf16[48,64], index: 1, kind: input, shape index: {}]   ;;  %s2462_s2 = inlined_call_operand.vmem [shape: f32[1,64], index: 2, kind: input, shape index: {}]   ;;  %s2463_s3 = inlined_call_operand.vmem [shape: bf16[9,64,12], index: 3, kind: input, shape index: {}]   ;;  %s2464_s4 = inlined_call_operand.vmem [shape: f32[1,12], index: 4, kind: input, shape index: {}]   ;;  %s2465_s5 = inlined_call_operand.vmem [shape: f32[2,64,12], index: 5, kind: output, shape index: {}]  }
   0x1 LB: > { %s1643_s19 = sadd.s32 4294967295, %s2116_s18   ;;  %p1647_p0 = scmp.ge.s32.totalorder %s2116_s18, 1  ;;  %s2116_s18 = sphi %s2149_s18, %s15_s18  }
   0x2   : > { %p187_p1 = scmp.lt.s32.totalorder %s2116_s18, 3 }
   0x4   : > { %p188_p2 = pnand %p1647_p0, %p187_p1 }
   0x6   : > { %191 = sbr.rel (%p188_p2) target bundleno = 527 (0x20f), region = 40 }
   0xb   : > { %v2051_v0 = vld [vmem:[%s2461_s1 + $0x10] sm:$0xff]   ;;  %p215_p3 = scmp.lt.s32.totalorder %s1643_s19, 1  ;;  %v2052_v1 = vld [vmem:[%s2461_s1 + $0x8] sm:$0xff]   ;;  %vm285_vm0 = vcmask 392192   ;;  %v2053_v2 = vld [vmem:[%s2461_s1] sm:$0xff]   ;;  %vm371_vm1 = vcmask 523264  }
   0xc   : > { %1884 = vmatprep.subr.bf16.mxu0 %v2051_v0  ;;  %vm373_vm2 = vcmask 517120   ;;  %v2058_v7 = vld [vmem:[%s2463_s3 + $0x38] sm:$0xff]   ;;  %v2118_v9 = vmov 0.0   ;;  %v2060_v10 = vld [vmem:[%s2463_s3 + $0x30] sm:$0xff]   ;;  %v2062_v12 = vld [vmem:[%s2463_s3 + $0x28] sm:$0xff]   ;;  %vm1579_vm3 = vcmask 97280  }
   0xd   : > { %s2471_s19 = smov (!%p215_p3, %s1643_s19), 1  ;;  %1885 = vmatpush3.bf16.msra.mxu0 %v2051_v0  ;;  %v2059_v8 = vld [vmem:[%s2463_s3 + $0x18] sm:$0xff]   ;;  %379 = vst.msk [vmem:[#allocation2 + $0x30] sm:$0xff] %vm371_vm1, %v2118_v9  ;;  %372 = vst.msk [vmem:[#allocation2] sm:$0xff] %vm371_vm1, %v2118_v9  ;;  %1898 = vmatprep.subr.bf16.mxu1 %v2058_v7  ;;  %v2061_v11 = vld [vmem:[%s2463_s3 + $0x10] sm:$0xff]  }
   0xe   : > { %1886 = vmatprep.subr.bf16.mxu0 %v2052_v1  ;;  %s1803_s26 = sshll.u32 %s2471_s19, 5  ;;  %380 = vst.msk [vmem:[#allocation2 + $0x38] sm:$0x3] %vm373_vm2, %v2118_v9  ;;  %374 = vst.msk [vmem:[#allocation2 + $0x8] sm:$0x3] %vm373_vm2, %v2118_v9  ;;  %1899 = vmatpush3.bf16.msra.mxu1 %v2058_v7  ;;  %v2063_v13 = vld [vmem:[%s2463_s3 + $0x8] sm:$0xff]  }
   0xf   : > { %s219_s29 = scalar_lea.vmem %s2460_s0, %s1803_s26  ;;  %375 = vst.msk [vmem:[#allocation2 + $0x10] sm:$0xff] %vm371_vm1, %v2118_v9  ;;  %377 = vst.msk [vmem:[#allocation2 + $0x20] sm:$0xff] %vm371_vm1, %v2118_v9  ;;  %1900 = vmatprep.subr.bf16.mxu1 %v2060_v10  ;;  %v2064_v14 = vld [vmem:[%s2463_s3 + $0x20] sm:$0xff]   ;;  %v2066_v16 = vld [vmem:[%s2463_s3 + $0x58] sm:$0xff]   ;;  %s1804_s12 = sshll.u32 %s2471_s19, 6 }
  0x10   : > { %v2054_v3 = vld [vmem:[%s219_s29] sm:$0xff]   ;;  %v2055_v4 = vld [vmem:[%s219_s29 + $0x8] sm:$0xff]   ;;  %v2056_v5 = vld [vmem:[%s219_s29 + $0x10] sm:$0xff]   ;;  %376 = vst.msk [vmem:[#allocation2 + $0x18] sm:$0x3] %vm373_vm2, %v2118_v9  ;;  %s224_s15 = scalar_lea.vmem %s2465_s5, %s1804_s12 }
  0x11   : > { %1887 = vmatpush3.bf16.msra.mxu0 %v2052_v1  ;;  %1890 = vmatprep.mubr.msk.bf16.mxu0 %vm285_vm0, %v2054_v3  ;;  %v2057_v6 = vld [vmem:[%s219_s29 + $0x18] sm:$0xff]   ;;  %378 = vst.msk [vmem:[#allocation2 + $0x28] sm:$0x3] %vm373_vm2, %v2118_v9  ;;  %382 = vst.msk [vmem:[#allocation2 + $0x48] sm:$0x3] %vm373_vm2, %v2118_v9  ;;  %v2065_v15 = vld [vmem:[%s2463_s3] sm:$0xff]  }
  0x12   : > { %1888 = vmatprep.subr.bf16.mxu0 %v2053_v2  ;;  %381 = vst.msk [vmem:[#allocation2 + $0x40] sm:$0xff] %vm371_vm1, %v2118_v9  ;;  %383 = vst.msk [vmem:[#allocation2 + $0x50] sm:$0xff] %vm371_vm1, %v2118_v9  ;;  %1901 = vmatpush3.bf16.msra.mxu1 %v2060_v10  ;;  %v2067_v17 = vld [vmem:[%s2463_s3 + $0x78] sm:$0xff]   ;;  %v1652_v18 = vld [vmem:[%s2462_s2] ss:$0 sm:$0xff] }
  0x13   : > { %384 = vst.msk [vmem:[#allocation2 + $0x58] sm:$0x3] %vm373_vm2, %v2118_v9  ;;  %386 = vst.msk [vmem:[#allocation2 + $0x68] sm:$0x3] %vm373_vm2, %v2118_v9  ;;  %1902 = vmatprep.subr.bf16.mxu1 %v2062_v12  ;;  %v2068_v55 = vld [vmem:[%s2463_s3 + $0x50] sm:$0xff]   ;;  %v2070_v63 = vld [vmem:[%s2463_s3 + $0x48] sm:$0xff]  }
  0x14   : > { %385 = vst.msk [vmem:[#allocation2 + $0x60] sm:$0xff] %vm371_vm1, %v2118_v9  ;;  %387 = vst.msk [vmem:[#allocation2 + $0x70] sm:$0xff] %vm371_vm1, %v2118_v9  ;;  %v402_v38 = vld [vmem:[#allocation2] sm:$0xff]  ;;  %v2069_v56 = vld [vmem:[%s2463_s3 + $0x70] sm:$0xff]  }
  0x15   : > { %1889 = vmatpush3.bf16.msra.mxu0 %v2053_v2  ;;  %388 = vst.msk [vmem:[#allocation2 + $0x78] sm:$0x3] %vm373_vm2, %v2118_v9  ;;  %390 = vst.msk [vmem:[#allocation2 + $0x88] sm:$0x3] %vm373_vm2, %v2118_v9  ;;  %v422_v37 = vld [vmem:[#allocation2 + $0x1] sm:$0xff] }
  0x16   : > { %389 = vst.msk [vmem:[#allocation2 + $0x80] sm:$0xff] %vm371_vm1, %v2118_v9  ;;  %391 = vst.msk [vmem:[#allocation2 + $0x90] sm:$0xff] %vm371_vm1, %v2118_v9  ;;  %1914 = vmatprep.subr.bf16.mxu0 %v2059_v8  ;;  %1903 = vmatpush3.bf16.msra.mxu1 %v2062_v12  ;;  %v2071_v0 = vld [vmem:[%s2463_s3 + $0x68] sm:$0xff]   ;;  %v2072_v10 = vld [vmem:[%s2463_s3 + $0x40] sm:$0xff]  }
  0x17   : > { %392 = vst.msk [vmem:[#allocation2 + $0x98] sm:$0x3] %vm373_vm2, %v2118_v9  ;;  %1904 = vmatprep.subr.bf16.mxu1 %v2064_v14  ;;  %v645_v2 = vld [vmem:[#allocation2 + $0x2] sm:$0xff] }
  0x18   : > { %1891 = vmatmul.mubr.msk.bf16.vlgmr.msra.gmra.mxu0 %vm285_vm0, %v2055_v4 }
  0x19   : > { %1894 = vmatprep.mubr.msk.bf16.mxu0 %vm285_vm0, %v2056_v5  ;;  %1915 = vmatpush3.bf16.msra.mxu0 %v2059_v8 }
  0x1a   : > { %1916 = vmatprep.subr.bf16.mxu0 %v2061_v11  ;;  %1905 = vmatpush3.bf16.msra.mxu1 %v2064_v14 }
  0x1b   : > { %1930 = vmatprep.subr.bf16.mxu1 %v2066_v16 }
  0x1d   : > { %1917 = vmatpush3.bf16.msra.mxu0 %v2061_v11  ;;  %v2073_v11 = vld [vmem:[%s2463_s3 + $0x60] sm:$0xff]  }
  0x1e   : > { %1918 = vmatprep.subr.bf16.mxu0 %v2063_v13 }
  0x20   : > { %1895 = vmatmul.mubr.msk.bf16.gmra.mxu0 %vm285_vm0, %v2057_v6 }
  0x21   : > { %1919 = vmatpush3.bf16.msra.mxu0 %v2063_v13  ;;  %v2074_v13 = vld [vmem:[%s2463_s3 + $0x98] sm:$0xff]  }
  0x22   : > { %1920 = vmatprep.subr.bf16.mxu0 %v2065_v15 }
  0x25   : > { %1921 = vmatpush3.bf16.msra.mxu0 %v2065_v15  ;;  %v2075_v15 = vld [vmem:[%s2463_s3 + $0xb8] sm:$0xff]  }
  0x26   : > { %1946 = vmatprep.subr.bf16.mxu0 %v2067_v17 }
  0xd8   : > { %v1892_v19 = vpop.f32.mrf.mxu0 }
  0xd9   : > { %v341_v20 = vadd.f32 %v1892_v19, %v1652_v18 }
  0xda   : > { %v332_v21 = vpop.f32.mrf.mxu0 }
  0xdb   : > { %v365_v22 = vmax.f32 %v341_v20, 0.0  ;;  %v333_v23 = vadd.f32 %v1652_v18, %v332_v21  ;;  %v2076_v21 = vld [vmem:[%s2463_s3 + $0x90] sm:$0xff]  }
  0xdc   : > { %v1893_v24 = vpop.f32.mrf.mxu0 }
  0xdd   : > { %396 = vst.msk [vmem:[#allocation2 + $0x31] sm:$0xff] %vm371_vm1, %v365_v22  ;;  %v363_v25 = vmax.f32 %v333_v23, 0.0  ;;  %v344_v26 = vadd.f32 %v1893_v24, %v1652_v18  ;;  %v2077_v24 = vld [vmem:[%s2463_s3 + $0xb0] sm:$0xff]  }
  0xde   : > { %v335_v27 = vpop.f32.mrf.mxu0 }
  0xdf   : > { %394 = vst.msk [vmem:[#allocation2 + $0x11] sm:$0xff] %vm371_vm1, %v363_v25  ;;  %v366_v28 = vmax.f32 %v344_v26, 0.0  ;;  %v336_v29 = vadd.f32 %v1652_v18, %v335_v27  ;;  %v2078_v25 = vld [vmem:[%s2463_s3 + $0x88] sm:$0xff]  }
  0xe0   : > { %v1896_v30 = vpop.f32.mrf.mxu0 }
  0xe1   : > { %397 = vst.msk [vmem:[#allocation2 + $0x41] sm:$0xff] %vm371_vm1, %v366_v28  ;;  %v364_v31 = vmax.f32 %v336_v29, 0.0  ;;  %v357_v32 = vadd.f32 %v1896_v30, %v1652_v18  ;;  %v2079_v28 = vld [vmem:[%s2463_s3 + $0xa8] sm:$0xff]  }
  0xe2   : > { %v348_v33 = vpop.f32.mrf.mxu0 }
  0xe3   : > { %395 = vst.msk [vmem:[#allocation2 + $0x21] sm:$0xff] %vm371_vm1, %v364_v31  ;;  %v369_v34 = vmax.f32 %v357_v32, 0.0  ;;  %v349_v35 = vadd.f32 %v1652_v18, %v348_v33  ;;  %v2080_v32 = vld [vmem:[%s2463_s3 + $0x80] sm:$0xff]  }
  0xe4   : > { %v1897_v36 = vpop.f32.mrf.mxu0  ;;  %v2241_v49 = vld [vmem:[#allocation2 + $0x31] sm:$0xff] }
  0xe5   : > { %400 = vst.msk [vmem:[#allocation2 + $0x71] sm:$0xff] %vm371_vm1, %v369_v34  ;;  %v367_v39 = vmax.f32 %v349_v35, 0.0  ;;  %v360_v40 = vadd.f32 %v1897_v36, %v1652_v18  ;;  %v2245_v52 = vld [vmem:[#allocation2 + $0x30] sm:$0xff]  ;;  %v2081_v35 = vld [vmem:[%s2463_s3 + $0xa0] sm:$0xff]   ;;  %v2082_v36 = vld [vmem:[%s2463_s3 + $0xd8] sm:$0xff]  }
  0xe6   : > { %v351_v41 = vpop.f32.mrf.mxu0  ;;  %v2234_v42 = vld [vmem:[#allocation2 + $0x11] sm:$0xff] }
  0xe7   : > { %v403_v43 = vld [vmem:[#allocation2 + $0x10] sm:$0xff]  ;;  %398 = vst.msk [vmem:[#allocation2 + $0x51] sm:$0xff] %vm371_vm1, %v367_v39  ;;  %v370_v44 = vmax.f32 %v360_v40, 0.0  ;;  %v352_v45 = vadd.f32 %v1652_v18, %v351_v41  ;;  %v430_v46 = vpack.c.bf16 %v2234_v42, %v422_v37  ;;  %v2083_v37 = vld [vmem:[%s2463_s3 + $0xf8] sm:$0xff]  }
  0xe8   : > { %v410_v47 = vpack.c.bf16 %v403_v43, %v402_v38  ;;  %v2265_v57 = vld [vmem:[#allocation2 + $0x41] sm:$0xff]  ;;  %v2287_v3 = vld [vmem:[#allocation2 + $0x12] sm:$0xff] }
  0xe9   : > { %401 = vst.msk [vmem:[#allocation2 + $0x81] sm:$0xff] %vm371_vm1, %v370_v44  ;;  %v368_v48 = vmax.f32 %v352_v45, 0.0  ;;  %1906 = vmatprep.mubr.msk.bf16.mxu1 %vm371_vm1, %v430_v46  ;;  %v406_v59 = vld [vmem:[#allocation2 + $0x40] sm:$0xff]  ;;  %v653_v9 = vpack.c.bf16 %v2287_v3, %v645_v2  ;;  %v914_v38 = vpack.c.bf16 %v2265_v57, %v2241_v49  ;;  %v2084_v39 = vld [vmem:[%s2463_s3 + $0xd0] sm:$0xff]   ;;  %v2086_v44 = vld [vmem:[%s2463_s3 + $0xc8] sm:$0xff]  }
  0xea   : > { %1922 = vmatprep.mubr.msk.bf16.mxu0 %vm371_vm1, %v410_v47  ;;  %v2243_v50 = vld [vmem:[#allocation2 + $0x21] sm:$0xff]  ;;  %v784_v19 = vpack.c.bf16 %v406_v59, %v2245_v52 }
  0xeb   : > { %v404_v51 = vld [vmem:[#allocation2 + $0x20] sm:$0xff]  ;;  %399 = vst.msk [vmem:[#allocation2 + $0x61] sm:$0xff] %vm371_vm1, %v368_v48  ;;  %v2250_v53 = vpack.c.bf16 %v2241_v49, %v2243_v50  ;;  %v913_v33 = vpack.c.bf16 %v2243_v50, %v2234_v42  ;;  %v2085_v42 = vld [vmem:[%s2463_s3 + $0xf0] sm:$0xff]   ;;  %v2087_v46 = vld [vmem:[%s2463_s3 + $0xe8] sm:$0xff]  }
  0xec   : > { %v2253_v54 = vpack.c.bf16 %v2245_v52, %v404_v51  ;;  %v2285_v1 = vld [vmem:[#allocation2 + $0x71] sm:$0xff]  ;;  %v783_v12 = vpack.c.bf16 %v404_v51, %v403_v43  ;;  %v647_v14 = vld [vmem:[#allocation2 + $0x22] sm:$0xff] }
  0xed   : > { %1907 = vmatmul.mubr.msk.bf16.vlgmr.msra.gmra.mxu1 %vm371_vm1, %v2250_v53  ;;  %v409_v6 = vld [vmem:[#allocation2 + $0x70] sm:$0xff]  ;;  %v649_v20 = vld [vmem:[#allocation2 + $0x42] sm:$0xff]  ;;  %v1043_v34 = vpack.c.bf16 %v647_v14, %v2287_v3  ;;  %v2090_v52 = vld [vmem:[%s2463_s3 + $0x118] sm:$0xff]  }
  0xee   : > { %1923 = vmatmul.mubr.msk.bf16.vlgmr.msra.gmra.mxu0 %vm371_vm1, %v2253_v54  ;;  %1931 = vmatpush3.bf16.msra.mxu1 %v2066_v16  ;;  %v2267_v58 = vld [vmem:[#allocation2 + $0x51] sm:$0xff]  ;;  %v2088_v49 = vld [vmem:[%s2463_s3 + $0xc0] sm:$0xff]  }
  0xef   : > { %1947 = vmatpush3.bf16.msra.mxu0 %v2067_v17  ;;  %v407_v60 = vld [vmem:[#allocation2 + $0x50] sm:$0xff]  ;;  %1932 = vmatprep.subr.bf16.mxu1 %v2068_v55  ;;  %v2271_v61 = vpack.c.bf16 %v2267_v58, %v2265_v57  ;;  %v2089_v51 = vld [vmem:[%s2463_s3 + $0xe0] sm:$0xff]  }
  0xf0   : > { %v2273_v62 = vpack.c.bf16 %v407_v60, %v406_v59  ;;  %1948 = vmatprep.subr.bf16.mxu0 %v2069_v56  ;;  %v648_v16 = vld [vmem:[#allocation2 + $0x32] sm:$0xff]  ;;  %v2336_v27 = vld [vmem:[#allocation2 + $0x80] sm:$0xff] }
  0xf1   : > { %1910 = vmatprep.mubr.msk.bf16.mxu1 %vm371_vm1, %v2271_v61  ;;  %v650_v17 = vld [vmem:[#allocation2 + $0x52] sm:$0xff]  ;;  %v2316_v18 = vpack.c.bf16 %v648_v16, %v647_v14  ;;  %v786_v31 = vpack.c.bf16 %v2336_v27, %v409_v6  ;;  %v1044_v41 = vpack.c.bf16 %v649_v20, %v648_v16  ;;  %v912_v45 = vld [vmem:[#allocation2 + $0x81] sm:$0xff] }
  0xf2   : > { %1926 = vmatprep.mubr.msk.bf16.mxu0 %vm371_vm1, %v2273_v62  ;;  %1933 = vmatpush3.bf16.msra.mxu1 %v2068_v55  ;;  %v2289_v4 = vld [vmem:[#allocation2 + $0x61] sm:$0xff]  ;;  %v2324_v22 = vpack.c.bf16 %v650_v17, %v649_v20  ;;  %v652_v29 = vld [vmem:[#allocation2 + $0x72] sm:$0xff]  ;;  %v916_v48 = vpack.c.bf16 %v912_v45, %v2285_v1 }
  0xf3   : > { %1949 = vmatpush3.bf16.msra.mxu0 %v2069_v56  ;;  %v408_v5 = vld [vmem:[#allocation2 + $0x60] sm:$0xff]  ;;  %1934 = vmatprep.subr.bf16.mxu1 %v2070_v63  ;;  %v2293_v7 = vpack.c.bf16 %v2285_v1, %v2289_v4  ;;  %v915_v40 = vpack.c.bf16 %v2289_v4, %v2267_v58  ;;  %v2091_v55 = vld [vmem:[%s2463_s3 + $0x110] sm:$0xff]  }
  0xf4   : > { %v2295_v8 = vpack.c.bf16 %v409_v6, %v408_v5  ;;  %1950 = vmatprep.subr.bf16.mxu0 %v2071_v0  ;;  %v785_v23 = vpack.c.bf16 %v408_v5, %v407_v60  ;;  %v651_v26 = vld [vmem:[#allocation2 + $0x62] sm:$0xff]  ;;  %v1303_v56 = vld [vmem:[#allocation2 + $0x91] sm:$0xff] }
  0xf5   : > { %1911 = vmatmul.mubr.msk.bf16.gmra.mxu1 %vm371_vm1, %v2293_v7  ;;  %v2341_v30 = vpack.c.bf16 %v652_v29, %v651_v26  ;;  %v1045_v43 = vpack.c.bf16 %v651_v26, %v650_v17  ;;  %v1042_v47 = vld [vmem:[#allocation2 + $0x82] sm:$0xff]  ;;  %v1307_v59 = vpack.c.bf16 %v1303_v56, %v912_v45  ;;  %v1433_v60 = vld [vmem:[#allocation2 + $0x92] sm:$0xff] }
  0xf6   : > { %1927 = vmatmul.mubr.msk.bf16.gmra.mxu0 %vm371_vm1, %v2295_v8  ;;  %1935 = vmatpush3.bf16.msra.mxu1 %v2070_v63  ;;  %v1046_v50 = vpack.c.bf16 %v1042_v47, %v652_v29  ;;  %v2093_v58 = vld [vmem:[%s2463_s3 + $0x100] sm:$0xff]  }
  0xf7   : > { %1938 = vmatprep.mubr.msk.bf16.mxu1 %vm371_vm1, %v653_v9  ;;  %1951 = vmatpush3.bf16.msra.mxu0 %v2071_v0 }
  0xf8   : > { %1954 = vmatprep.mubr.msk.bf16.mxu0 %vm371_vm1, %v783_v12  ;;  %1936 = vmatprep.subr.bf16.mxu1 %v2072_v10 }
  0xf9   : > { %1952 = vmatprep.subr.bf16.mxu0 %v2073_v11 }
  0xfa   : > { %1937 = vmatpush3.bf16.msra.mxu1 %v2072_v10 }
  0xfb   : > { %1953 = vmatpush3.bf16.msra.mxu0 %v2073_v11  ;;  %1962 = vmatprep.subr.bf16.mxu1 %v2074_v13 }
  0xfc   : > { %1978 = vmatprep.subr.bf16.mxu0 %v2075_v15 }
  0xfd   : > { %1939 = vmatmul.mubr.msk.bf16.vlgmr.msra.gmra.mxu1 %vm371_vm1, %v2316_v18 }
  0xfe   : > { %1955 = vmatmul.mubr.msk.bf16.vlgmr.msra.gmra.mxu0 %vm371_vm1, %v784_v19  ;;  %1963 = vmatpush3.bf16.msra.mxu1 %v2074_v13 }
  0xff   : > { %1942 = vmatprep.mubr.msk.bf16.mxu1 %vm371_vm1, %v2324_v22  ;;  %1958 = vmatprep.mubr.msk.bf16.mxu0 %vm371_vm1, %v785_v23 }
 0x100   : > { %1979 = vmatpush3.bf16.msra.mxu0 %v2075_v15  ;;  %1964 = vmatprep.subr.bf16.mxu1 %v2076_v21 }
 0x101   : > { %1980 = vmatprep.subr.bf16.mxu0 %v2077_v24 }
 0x102   : > { %1965 = vmatpush3.bf16.msra.mxu1 %v2076_v21 }
 0x103   : > { %1966 = vmatprep.subr.bf16.mxu1 %v2078_v25 }
 0x104   : > { %1981 = vmatpush3.bf16.msra.mxu0 %v2077_v24 }
 0x105   : > { %1943 = vmatmul.mubr.msk.bf16.gmra.mxu1 %vm371_vm1, %v2341_v30  ;;  %1982 = vmatprep.subr.bf16.mxu0 %v2079_v28 }
 0x106   : > { %1959 = vmatmul.mubr.msk.bf16.gmra.mxu0 %vm371_vm1, %v786_v31  ;;  %1967 = vmatpush3.bf16.msra.mxu1 %v2078_v25 }
 0x107   : > { %1970 = vmatprep.mubr.msk.bf16.mxu1 %vm371_vm1, %v913_v33  ;;  %1986 = vmatprep.mubr.msk.bf16.mxu0 %vm371_vm1, %v1043_v34 }
 0x108   : > { %1983 = vmatpush3.bf16.msra.mxu0 %v2079_v28  ;;  %1968 = vmatprep.subr.bf16.mxu1 %v2080_v32 }
 0x109   : > { %1984 = vmatprep.subr.bf16.mxu0 %v2081_v35 }
 0x10a   : > { %1969 = vmatpush3.bf16.msra.mxu1 %v2080_v32 }
 0x10b   : > { %1994 = vmatprep.subr.bf16.mxu1 %v2082_v36 }
 0x10c   : > { %1985 = vmatpush3.bf16.msra.mxu0 %v2081_v35 }
 0x10d   : > { %1971 = vmatmul.mubr.msk.bf16.vlgmr.msra.gmra.mxu1 %vm371_vm1, %v914_v38  ;;  %2010 = vmatprep.subr.bf16.mxu0 %v2083_v37 }
 0x10e   : > { %1995 = vmatpush3.bf16.msra.mxu1 %v2082_v36  ;;  %1974 = vmatprep.mubr.msk.bf16.mxu1 %vm371_vm1, %v915_v40 }
 0x10f   : > { %1987 = vmatmul.mubr.msk.bf16.vlgmr.msra.gmra.mxu0 %vm371_vm1, %v1044_v41  ;;  %1996 = vmatprep.subr.bf16.mxu1 %v2084_v39 }
 0x110   : > { %1990 = vmatprep.mubr.msk.bf16.mxu0 %vm371_vm1, %v1045_v43  ;;  %2011 = vmatpush3.bf16.msra.mxu0 %v2083_v37 }
 0x111   : > { %2012 = vmatprep.subr.bf16.mxu0 %v2085_v42 }
 0x112   : > { %1997 = vmatpush3.bf16.msra.mxu1 %v2084_v39 }
 0x113   : > { %1998 = vmatprep.subr.bf16.mxu1 %v2086_v44 }
 0x114   : > { %2013 = vmatpush3.bf16.msra.mxu0 %v2085_v42 }
 0x115   : > { %1975 = vmatmul.mubr.msk.bf16.gmra.mxu1 %vm371_vm1, %v916_v48  ;;  %2014 = vmatprep.subr.bf16.mxu0 %v2087_v46 }
 0x116   : > { %1999 = vmatpush3.bf16.msra.mxu1 %v2086_v44  ;;  %2002 = vmatprep.mubr.msk.bf16.mxu1 %vm371_vm1, %v2253_v54  ;;  %v1173_v54 = vld [vmem:[#allocation2 + $0x90] sm:$0xff] }
 0x117   : > { %1991 = vmatmul.mubr.msk.bf16.gmra.mxu0 %vm371_vm1, %v1046_v50  ;;  %2000 = vmatprep.subr.bf16.mxu1 %v2088_v49  ;;  %v1177_v57 = vpack.c.bf16 %v1173_v54, %v2336_v27 }
 0x118   : > { %2015 = vmatpush3.bf16.msra.mxu0 %v2087_v46  ;;  %2018 = vmatprep.mubr.msk.bf16.mxu0 %vm371_vm1, %v2250_v53  ;;  %v2092_v53 = vld [vmem:[%s2463_s3 + $0x108] sm:$0xff]  }
 0x119   : > { %2016 = vmatprep.subr.bf16.mxu0 %v2089_v51 }
 0x11a   : > { %2001 = vmatpush3.bf16.msra.mxu1 %v2088_v49 }
 0x11b   : > { %2026 = vmatprep.subr.bf16.mxu1 %v2090_v52 }
 0x11c   : > { %2017 = vmatpush3.bf16.msra.mxu0 %v2089_v51 }
 0x11d   : > { %2003 = vmatmul.mubr.msk.bf16.vlgmr.msra.gmra.mxu1 %vm371_vm1, %v2273_v62 }
 0x11e   : > { %2027 = vmatpush3.bf16.msra.mxu1 %v2090_v52  ;;  %2006 = vmatprep.mubr.msk.bf16.mxu1 %vm371_vm1, %v2295_v8 }
 0x11f   : > { %2019 = vmatmul.mubr.msk.bf16.vlgmr.msra.gmra.mxu0 %vm371_vm1, %v2271_v61  ;;  %2028 = vmatprep.subr.bf16.mxu1 %v2091_v55  ;;  %v1437_v61 = vpack.c.bf16 %v1433_v60, %v1042_v47 }
 0x120   : > { %2022 = vmatprep.mubr.msk.bf16.mxu0 %vm371_vm1, %v2293_v7 }
 0x122   : > { %2029 = vmatpush3.bf16.msra.mxu1 %v2091_v55 }
 0x123   : > { %2030 = vmatprep.subr.bf16.mxu1 %v2092_v53 }
 0x125   : > { %2007 = vmatmul.mubr.msk.bf16.gmra.mxu1 %vm371_vm1, %v1177_v57 }
 0x126   : > { %2031 = vmatpush3.bf16.msra.mxu1 %v2092_v53  ;;  %2034 = vmatprep.mubr.msk.bf16.mxu1 %vm371_vm1, %v2316_v18 }
 0x127   : > { %2023 = vmatmul.mubr.msk.bf16.gmra.mxu0 %vm371_vm1, %v1307_v59  ;;  %2032 = vmatprep.subr.bf16.mxu1 %v2093_v58 }
 0x12a   : > { %2033 = vmatpush3.bf16.msra.mxu1 %v2093_v58 }
 0x12d   : > { %2035 = vmatmul.mubr.msk.bf16.vlgmr.msra.gmra.mxu1 %vm371_vm1, %v2324_v22 }
 0x12e   : > { %2038 = vmatprep.mubr.msk.bf16.mxu1 %vm371_vm1, %v2341_v30 }
 0x135   : > { %2039 = vmatmul.mubr.msk.bf16.gmra.mxu1 %vm371_vm1, %v1437_v61 }
 0x1ad   : > { %v1908_v62 = vpop.f32.mrf.mxu1 }
 0x1ae   : > { %v1924_v63 = vpop.f32.mrf.mxu0 }
 0x1af   : > { %v513_v0 = vpop.f32.mrf.mxu1  ;;  %v623_v43 = vadd.f32 %v1924_v63, %v1908_v62 }
 0x1b0   : > { %v614_v1 = vpop.f32.mrf.mxu0 }
 0x1b1   : > { %v1909_v2 = vpop.f32.mrf.mxu1  ;;  %v615_v46 = vadd.f32 %v614_v1, %v513_v0 }
 0x1b2   : > { %v1925_v3 = vpop.f32.mrf.mxu0 }
 0x1b3   : > { %v516_v4 = vpop.f32.mrf.mxu1  ;;  %v626_v50 = vadd.f32 %v1925_v3, %v1909_v2 }
 0x1b4   : > { %v617_v5 = vpop.f32.mrf.mxu0 }
 0x1b5   : > { %v1912_v6 = vpop.f32.mrf.mxu1  ;;  %v618_v53 = vadd.f32 %v617_v5, %v516_v4 }
 0x1b6   : > { %v1928_v7 = vpop.f32.mrf.mxu0 }
 0x1b7   : > { %v529_v8 = vpop.f32.mrf.mxu1  ;;  %v639_v57 = vadd.f32 %v1928_v7, %v1912_v6 }
 0x1b8   : > { %v630_v9 = vpop.f32.mrf.mxu0 }
 0x1b9   : > { %v1913_v10 = vpop.f32.mrf.mxu1  ;;  %v631_v63 = vadd.f32 %v630_v9, %v529_v8 }
 0x1ba   : > { %v1929_v11 = vpop.f32.mrf.mxu0 }
 0x1bb   : > { %v2427_v12 = vpop.f32.mrf.mxu1 }
 0x1bc   : > { %v633_v13 = vpop.f32.mrf.mxu0 }
 0x1bd   : > { %v1940_v14 = vpop.f32.mrf.mxu1  ;;  %v634_v5 = vadd.f32 %v633_v13, %v2427_v12 }
 0x1be   : > { %v1956_v15 = vpop.f32.mrf.mxu0  ;;  %v769_v47 = vadd.f32 %v1940_v14, %v623_v43  ;;  %v642_v43 = vadd.f32 %v1929_v11, %v1913_v10 }
 0x1bf   : > { %v736_v16 = vpop.f32.mrf.mxu1 }
 0x1c0   : > { %v866_v17 = vpop.f32.mrf.mxu0  ;;  %v767_v51 = vadd.f32 %v736_v16, %v615_v46  ;;  %v899_v54 = vadd.f32 %v1956_v15, %v769_v47 }
 0x1c1   : > { %v1941_v18 = vpop.f32.mrf.mxu1 }
 0x1c2   : > { %v1957_v19 = vpop.f32.mrf.mxu0  ;;  %v770_v56 = vadd.f32 %v1941_v18, %v626_v50  ;;  %v897_v60 = vadd.f32 %v866_v17, %v767_v51 }
 0x1c3   : > { %v739_v20 = vpop.f32.mrf.mxu1 }
 0x1c4   : > { %v869_v21 = vpop.f32.mrf.mxu0  ;;  %v768_v61 = vadd.f32 %v739_v20, %v618_v53  ;;  %v900_v1 = vadd.f32 %v1957_v19, %v770_v56 }
 0x1c5   : > { %v1944_v22 = vpop.f32.mrf.mxu1 }
 0x1c6   : > { %v1960_v23 = vpop.f32.mrf.mxu0  ;;  %v898_v16 = vadd.f32 %v869_v21, %v768_v61 }
 0x1c7   : > { %v752_v24 = vpop.f32.mrf.mxu1 }
 0x1c8   : > { %v882_v25 = vpop.f32.mrf.mxu0 }
 0x1c9   : > { %v1945_v26 = vpop.f32.mrf.mxu1 }
 0x1ca   : > { %v1961_v27 = vpop.f32.mrf.mxu0  ;;  %v774_v7 = vadd.f32 %v1945_v26, %v642_v43 }
 0x1cb   : > { %v755_v28 = vpop.f32.mrf.mxu1 }
 0x1cc   : > { %v2429_v29 = vpop.f32.mrf.mxu0  ;;  %v772_v9 = vadd.f32 %v755_v28, %v634_v5 }
 0x1cd   : > { %v1972_v30 = vpop.f32.mrf.mxu1 }
 0x1ce   : > { %v1029_v62 = vadd.f32 %v1972_v30, %v899_v54  ;;  %v902_v12 = vadd.f32 %v2429_v29, %v772_v9 }
 0x1cf   : > { %v1988_v31 = vpop.f32.mrf.mxu0  ;;  %v996_v32 = vpop.f32.mrf.mxu1 }
 0x1d0   : > { %v1027_v14 = vadd.f32 %v996_v32, %v897_v60  ;;  %v1159_v46 = vadd.f32 %v1988_v31, %v1029_v62 }
 0x1d1   : > { %v1126_v33 = vpop.f32.mrf.mxu0  ;;  %v1973_v34 = vpop.f32.mrf.mxu1 }
 0x1d2   : > { %v1030_v4 = vadd.f32 %v1973_v34, %v900_v1  ;;  %v1157_v17 = vadd.f32 %v1126_v33, %v1027_v14 }
 0x1d3   : > { %v1989_v35 = vpop.f32.mrf.mxu0  ;;  %v999_v36 = vpop.f32.mrf.mxu1 }
 0x1d4   : > { %v1028_v18 = vadd.f32 %v999_v36, %v898_v16  ;;  %v1160_v10 = vadd.f32 %v1989_v35, %v1030_v4 }
 0x1d5   : > { %v1129_v37 = vpop.f32.mrf.mxu0  ;;  %v1976_v38 = vpop.f32.mrf.mxu1 }
 0x1d6   : > { %v1158_v31 = vadd.f32 %v1129_v37, %v1028_v18 }
 0x1d7   : > { %v1992_v39 = vpop.f32.mrf.mxu0  ;;  %v1012_v40 = vpop.f32.mrf.mxu1 }
 0x1d9   : > { %v2431_v41 = vpop.f32.mrf.mxu0  ;;  %v1977_v42 = vpop.f32.mrf.mxu1 }
 0x1db   : > { %v2433_v44 = vpop.f32.mrf.mxu0  ;;  %v1015_v45 = vpop.f32.mrf.mxu1 }
 0x1dc   : > { %2466 = vst [vmem:[#allocation3_spill] sm:$0xff] %v2433_v44  ;;  %v773_v44 = vadd.f32 %v1944_v22, %v639_v57 }
 0x1dd   : > { %v2435_v48 = vpop.f32.mrf.mxu0  ;;  %v2004_v49 = vpop.f32.mrf.mxu1 }
 0x1de   : > { %2467 = vst [vmem:[#allocation4_spill] sm:$0xff] %v2435_v48  ;;  %v771_v48 = vadd.f32 %v752_v24, %v631_v63  ;;  %v903_v6 = vadd.f32 %v1960_v23, %v773_v44  ;;  %v1290_v20 = vadd.f32 %v2004_v49, %v1159_v46  ;;  %v904_v24 = vadd.f32 %v1961_v27, %v774_v7 }
 0x1df   : > { %v2020_v52 = vpop.f32.mrf.mxu0  ;;  %v1257_v55 = vpop.f32.mrf.mxu1 }
 0x1e0   : > { %v901_v8 = vadd.f32 %v882_v25, %v771_v48  ;;  %v1033_v22 = vadd.f32 %v1976_v38, %v903_v6  ;;  %v1288_v11 = vadd.f32 %v1257_v55, %v1157_v17  ;;  %v1420_v34 = vadd.f32 %v2020_v52, %v1290_v20  ;;  %v1800_v25 = vld [vmem:[%s2464_s4] ss:$0 sm:$0xff] }
 0x1e1   : > { %v1387_v58 = vpop.f32.mrf.mxu0  ;;  %v2005_v59 = vpop.f32.mrf.mxu1  ;;  %v1034_v23 = vadd.f32 %v1977_v42, %v904_v24  ;;  %v1032_v38 = vadd.f32 %v1015_v45, %v902_v12 }
 0x1e2   : > { %v1031_v32 = vadd.f32 %v1012_v40, %v901_v8  ;;  %v1291_v47 = vadd.f32 %v2005_v59, %v1160_v10  ;;  %v1163_v13 = vadd.f32 %v1992_v39, %v1033_v22  ;;  %v1418_v28 = vadd.f32 %v1387_v58, %v1288_v11 }
 0x1e3   : > { %v1260_v0 = vpop.f32.mrf.mxu1  ;;  %v2021_v2 = vpop.f32.mrf.mxu0  ;;  %v2468_v29 = vld [vmem:[#allocation3_spill] sm:$0xff] }
 0x1e4   : > { %v1289_v36 = vadd.f32 %v1260_v0, %v1158_v31  ;;  %v1161_v27 = vadd.f32 %v2431_v41, %v1031_v32  ;;  %v1421_v44 = vadd.f32 %v2021_v2, %v1291_v47  ;;  %v1164_v39 = vadd.f32 %v2468_v29, %v1034_v23 }
 0x1e5   : > { %v2008_v3 = vpop.f32.mrf.mxu1  ;;  %v1390_v19 = vpop.f32.mrf.mxu0  ;;  %v2469_v54 = vld [vmem:[#allocation4_spill] sm:$0xff] }
 0x1e6   : > { %v1294_v40 = vadd.f32 %v2008_v3, %v1163_v13  ;;  %v1419_v52 = vadd.f32 %v1390_v19, %v1289_v36  ;;  %v1162_v56 = vadd.f32 %v2469_v54, %v1032_v38 }
 0x1e7   : > { %v1273_v15 = vpop.f32.mrf.mxu1  ;;  %v2024_v26 = vpop.f32.mrf.mxu0 }
 0x1e8   : > { %v1292_v42 = vadd.f32 %v1273_v15, %v1161_v27  ;;  %v1424_v57 = vadd.f32 %v2024_v26, %v1294_v40 }
 0x1e9   : > { %v2009_v30 = vpop.f32.mrf.mxu1  ;;  %v1403_v50 = vpop.f32.mrf.mxu0 }
 0x1ea   : > { %v1295_v41 = vadd.f32 %v2009_v30, %v1164_v39  ;;  %v1422_v60 = vadd.f32 %v1403_v50, %v1292_v42 }
 0x1eb   : > { %v1276_v21 = vpop.f32.mrf.mxu1  ;;  %v2025_v61 = vpop.f32.mrf.mxu0 }
 0x1ec   : > { %v1293_v63 = vadd.f32 %v1276_v21, %v1162_v56  ;;  %v1425_v43 = vadd.f32 %v2025_v61, %v1295_v41 }
 0x1ed   : > { %v2036_v33 = vpop.f32.mrf.mxu1  ;;  %v1406_v16 = vpop.f32.mrf.mxu0 }
 0x1ee   : > { %v1550_v35 = vadd.f32 %v2036_v33, %v1420_v34  ;;  %v1423_v4 = vadd.f32 %v1406_v16, %v1293_v63 }
 0x1ef   : > { %v1517_v37 = vpop.f32.mrf.mxu1 }
 0x1f0   : > { %v1565_v48 = vadd.f32 %v1800_v25, %v1550_v35  ;;  %v1548_v49 = vadd.f32 %v1517_v37, %v1418_v28 }
 0x1f1   : > { %v2037_v51 = vpop.f32.mrf.mxu1 }
 0x1f2   : > { %2094 = vtanh.f32 %v1565_v48  ;;  %v1563_v55 = vadd.f32 %v1800_v25, %v1548_v49  ;;  %v1551_v53 = vadd.f32 %v2037_v51, %v1421_v44 }
 0x1f3   : > { %v1520_v58 = vpop.f32.mrf.mxu1 }
 0x1f4   : > { %2096 = vtanh.f32 %v1563_v55  ;;  %v1566_v45 = vadd.f32 %v1800_v25, %v1551_v53  ;;  %v1549_v59 = vadd.f32 %v1520_v58, %v1419_v52 }
 0x1f5   : > { %v2040_v62 = vpop.f32.mrf.mxu1 }
 0x1f6   : > { %2098 = vtanh.f32 %v1566_v45  ;;  %v1564_v0 = vadd.f32 %v1800_v25, %v1549_v59  ;;  %v1554_v1 = vadd.f32 %v2040_v62, %v1424_v57 }
 0x1f7   : > { %v1533_v14 = vpop.f32.mrf.mxu1 }
 0x1f8   : > { %2100 = vtanh.f32 %v1564_v0  ;;  %v1569_v2 = vadd.f32 %v1800_v25, %v1554_v1  ;;  %v1552_v3 = vadd.f32 %v1533_v14, %v1422_v60 }
 0x1f9   : > { %v2041_v46 = vpop.f32.mrf.mxu1 }
 0x1fa   : > { %2102 = vtanh.f32 %v1569_v2  ;;  %v1567_v5 = vadd.f32 %v1800_v25, %v1552_v3  ;;  %v1555_v6 = vadd.f32 %v2041_v46, %v1425_v43 }
 0x1fb   : > { %v1536_v7 = vpop.f32.mrf.mxu1 }
 0x1fc   : > { %2104 = vtanh.f32 %v1567_v5  ;;  %v1570_v15 = vadd.f32 %v1800_v25, %v1555_v6  ;;  %v1553_v17 = vadd.f32 %v1536_v7, %v1423_v4 }
 0x1fe   : > { %2106 = vtanh.f32 %v1570_v15  ;;  %v1568_v18 = vadd.f32 %v1800_v25, %v1553_v17 }
 0x1ff   : > { %v2095_v20 = vpop.eup %2094 }
 0x200   : > { %1582 = vst.msk [vmem:[%s224_s15 + $0x10] sm:$0xff] %vm1579_vm3, %v2095_v20  ;;  %2108 = vtanh.f32 %v1568_v18 }
 0x201   : > { %v2097_v8 = vpop.eup %2096 }
 0x202   : > { %1580 = vst.msk [vmem:[%s224_s15] sm:$0xff] %vm1579_vm3, %v2097_v8 }
 0x203   : > { %v2099_v9 = vpop.eup %2098 }
 0x204   : > { %1583 = vst.msk [vmem:[%s224_s15 + $0x18] sm:$0xff] %vm1579_vm3, %v2099_v9 }
 0x205   : > { %v2101_v22 = vpop.eup %2100 }
 0x206   : > { %1581 = vst.msk [vmem:[%s224_s15 + $0x8] sm:$0xff] %vm1579_vm3, %v2101_v22 }
 0x207   : > { %v2103_v19 = vpop.eup %2102 }
 0x208   : > { %1586 = vst.msk [vmem:[%s224_s15 + $0x30] sm:$0xff] %vm1579_vm3, %v2103_v19 }
 0x209   : > { %v2105_v30 = vpop.eup %2104 }
 0x20a   : > { %1584 = vst.msk [vmem:[%s224_s15 + $0x20] sm:$0xff] %vm1579_vm3, %v2105_v30 }
 0x20b   : > { %v2107_v10 = vpop.eup %2106 }
 0x20c   : > { %1587 = vst.msk [vmem:[%s224_s15 + $0x38] sm:$0xff] %vm1579_vm3, %v2107_v10 }
 0x20d   : > { %v2109_v11 = vpop.eup %2108 }
 0x20e   : > { %1585 = vst.msk [vmem:[%s224_s15 + $0x28] sm:$0xff] %vm1579_vm3, %v2109_v11 }
 0x20f PF: > { %s15_s18 = sadd.s32 1, %s2116_s18  }
 0x210   : > { %p12_p4 = scmp.ge.s32.totalorder %s15_s18, 4  }
 0x212   :  { %14 = sbr.rel (!%p12_p4) target bundleno = 1 (0x1), region = 80 }

</bundles_post_ra>
